<compile_context>
chip_gen: v6e
topology: v6e:2x2x1
jax: 0.10.0
libtpu: 0.0.40
codegen_flags: <defaults>
</compile_context>

<pallas_src>
import jax
import jax.numpy as jnp
from jax.experimental import pallas as pl
from jax.experimental.pallas import tpu as pltpu


def _round_up(a: int, b: int) -> int:
    return -(-a // b) * b


# ----------------------------------------------------------------------------- kernel
def _upsample_matmul_kernel(x_ref, e_ref, o_ref):
    # x_ref: (mb, K)   e_ref: (K, N)   o_ref: (mb, N)
    x = x_ref[...].astype(e_ref.dtype)
    out = jnp.dot(x, e_ref[...], preferred_element_type=jnp.float32)
    o_ref[...] = out.astype(o_ref.dtype)


# ------------------------------------------------------------------- expansion matrices
def _monolithic_expansion(H: int, W: int, stride: int, dtype) -> jax.Array:
    """0/1 matrix E (H*W, Hs*Ws): (B*C, HW) @ E is the full NN upsample."""
    Hs, Ws = H * stride, W * stride
    q = jnp.arange(Hs * Ws, dtype=jnp.int32)
    src = (q // Ws // stride) * W + (q % Ws) // stride      # source pixel per output pos
    p = jnp.arange(H * W, dtype=jnp.int32)
    return (p[:, None] == src[None, :]).astype(dtype)       # (HW, HsWs)


def _factored_expansion(W: int, stride: int, dtype) -> jax.Array:
    """0/1 matrix E (W, s*Ws): (B*C*H, W) @ E, reshaped, is the full NN upsample
    (the H-replication is absorbed into the s*Ws output columns)."""
    Ws = W * stride
    n = jnp.arange(stride * Ws, dtype=jnp.int32)
    src = (n % Ws) // stride                                # source column per output col
    w = jnp.arange(W, dtype=jnp.int32)
    return (w[:, None] == src[None, :]).astype(dtype)       # (W, s*Ws)


# ------------------------------------------------------------------------ planning
def _vmem_capacity_bytes() -> int:
    try:
        info = pltpu.get_tpu_info()
    except Exception:
        return 64 << 20  # conservative default: v7x per-TensorCore VMEM
    for name in ("vmem_capacity_bytes", "vmem_size_bytes", "vmem_bytes"):
        v = getattr(info, name, None)
        if v is not None:
            try:
                v = int(v)
                if v > 0:
                    return v
            except Exception:
                pass
    return 64 << 20


def _pick_row_block(M, K, N, x_itemsize, e_itemsize, vmem_cap, two_cores):
    """Rows-per-block so double-buffered (in+out) blocks + E fit the VMEM budget.

    Footprints use lane-padded sizes (what the blocks actually occupy in VMEM)."""
    sub = {1: 32, 2: 16, 4: 8}.get(x_itemsize, 8)           # dtype sublane packing
    lane = 128
    row_bytes = (_round_up(K, lane) + _round_up(N, lane)) * x_itemsize
    e_bytes = _round_up(K, 8) * _round_up(N, lane) * e_itemsize
    # ~70% of this generation's VMEM (v5e/v6e: ~90 MiB of 128; v7x: ~45 MiB of 64).
    budget = min(int(vmem_cap * 0.70), 96 << 20)
    avail = max(budget - 2 * e_bytes - (4 << 20), 2 * row_bytes * sub)
    mb = int(min(M, avail // (2 * row_bytes)))              # 2 = double buffering in/out
    if mb < M:
        mb = max(sub, (mb // sub) * sub)                    # sublane-aligned when tiling
    # Dual-TensorCore parts (v7x-class) need >=2 "parallel" steps to feed both cores;
    # on single-TC chips a split only adds per-step overhead, so skip it there.
    if two_cores and -(-M // mb) < 2 and M >= 2 * sub:
        mb = max(sub, _round_up(M // 2, sub))
    return mb, row_bytes, e_bytes


# ------------------------------------------------------------------------ public API
def upsample(x: jax.Array, stride: int = 2) -> jax.Array:
    """Nearest-neighbor upsample of an NCHW tensor by an integer stride (YOLOv3 Upsample)."""
    assert x.ndim == 4, "expected (B, C, H, W)"
    s = int(stride)
    assert s >= 1
    B, C, H, W = x.shape
    Hs, Ws = H * s, W * s
    HW, HsWs = H * W, Hs * Ws

    if s == 1:
        return x

    # Matmul dtype: bf16 stays bf16 (0/1 matrix -> exact with f32 accumulate), else f32.
    if x.dtype == jnp.bfloat16 or x.dtype == jnp.float32:
        mm_dtype = x.dtype
    else:
        mm_dtype = jnp.float32

    x_itemsize = jnp.dtype(x.dtype).itemsize
    e_itemsize = jnp.dtype(mm_dtype).itemsize

    vmem_cap = _vmem_capacity_bytes()
    two_cores = vmem_cap <= (64 << 20)   # v7x: 64 MiB/TC & 2 TCs; v5e/v6e: 128 MiB & 1 TC

    # Path selection: monolithic only for tiny feature maps (13x13-class), where its
    # fully lane-dense output stores win and it is HBM-bound even on v5e-f32.  The
    # factored form (K = W, few-KiB E) handles everything larger and scales to
    # arbitrary feature maps without blowing VMEM or going MXU-bound.
    use_monolithic = (HW <= 192) and (HW * HsWs * e_itemsize <= (1 << 20))

    if use_monolithic:
        M, K, N = B * C, HW, HsWs
        expand = _monolithic_expansion(H, W, s, mm_dtype)
    else:
        M, K, N = B * C * H, W, s * Ws
        expand = _factored_expansion(W, s, mm_dtype)

    x2d = x.reshape(M, K)                                   # free reshape on contiguous NCHW

    mb, row_bytes, e_bytes = _pick_row_block(
        M, K, N, x_itemsize, e_itemsize, vmem_cap, two_cores)
    n_steps = -(-M // mb)

    # Explicit scoped-VMEM limit: never below what the plan needs, never above what
    # this generation physically has (guards the v7x 64 MiB cliff).
    vmem_needed = 2 * mb * row_bytes + 2 * e_bytes
    vmem_limit = max(vmem_needed + (4 << 20), 32 << 20)
    vmem_limit = min(vmem_limit, vmem_cap - (4 << 20))
    vmem_limit = int(max(vmem_limit, vmem_needed + (1 << 20)))

    out2d = pl.pallas_call(
        _upsample_matmul_kernel,
        out_shape=jax.ShapeDtypeStruct((M, N), x.dtype),
        grid=(n_steps,),
        in_specs=[
            # Row slab of the flattened input; block covers the full K axis.
            pl.BlockSpec((mb, K), lambda i: (i, 0)),
            # Expansion matrix: constant index -> DMA'd once, stays VMEM-resident.
            # (Tiny by construction, so double-buffering it costs <=2 MiB.)
            pl.BlockSpec((K, N), lambda i: (0, 0)),
        ],
        out_specs=pl.BlockSpec((mb, N), lambda i: (i, 0)),
        compiler_params=pltpu.CompilerParams(
            dimension_semantics=("parallel",),
            vmem_limit_bytes=vmem_limit,
        ),
    )(x2d, expand)

    return out2d.reshape(B, C, Hs, Ws)                      # free reshape


# ------------------------------------------------------------------------ self-test
def _reference(x, stride):
    return jnp.repeat(jnp.repeat(x, stride, axis=2), stride, axis=3)


if __name__ == "__main__":
    key = jax.random.PRNGKey(0)

    # Test 1: shapes implied by the module spec (f32, 16x16 -> factored K=W path).
    B, C, H, W = 2, 4, 16, 16
    stride = 2
    x = jax.random.normal(key, (B, C, H, W), dtype=jnp.float32)
    out = jax.block_until_ready(upsample(x, stride=stride))
    ref = _reference(x, stride)
    assert out.shape == (B, C, H * stride, W * stride), out.shape
    assert out.dtype == x.dtype, out.dtype
    assert jnp.array_equal(out, ref), "mismatch vs reference NN upsample (f32, factored)"

    # Test 2: YOLO 13x13 head, bf16 (monolithic lane-dense path), odd spatial size.
    x2 = jax.random.normal(jax.random.PRNGKey(1), (2, 20, 13, 13), dtype=jnp.bfloat16)
    out2 = jax.block_until_ready(upsample(x2, stride=2))
    ref2 = _reference(x2, 2)
    assert out2.shape == (2, 20, 26, 26), out2.shape
    assert out2.dtype == x2.dtype, out2.dtype
    assert jnp.array_equal(out2, ref2), "mismatch vs reference NN upsample (bf16, monolithic)"

    # Test 3: larger feature map (26x26, f32) exercising the scalable factored path
    # that replaced the (HW, HsWs) expansion matrix from v2.
    x3 = jax.random.normal(jax.random.PRNGKey(2), (1, 8, 26, 26), dtype=jnp.float32)
    out3 = jax.block_until_ready(upsample(x3, stride=2))
    ref3 = _reference(x3, 2)
    assert out3.shape == (1, 8, 52, 52), out3.shape
    assert jnp.array_equal(out3, ref3), "mismatch vs reference NN upsample (f32, 26x26)"

    print("KERNEL_OK")
</pallas_src>

<mosaic_0001>
module attributes {stable_mosaic.version = 11 : i64} {
  func.func @_upsample_matmul_kernel(%arg0: i32, %arg1: memref<64x16xf32, #tpu.memory_space<vmem>>, %arg2: memref<16x64xf32, #tpu.memory_space<vmem>>, %arg3: memref<64x64xf32, #tpu.memory_space<vmem>>) attributes {dimension_semantics = [#tpu.dimension_semantics<parallel>], iteration_bounds = array<i64: 2>, scalar_prefetch = 0 : i64, scratch_operands = 0 : i64, tpu.core_type = #tpu.core_type<tc>, window_params = [{transform_indices = @transform_0, window_bounds = array<i64: 64, 16>}, {pipeline_mode = #tpu.pipeline_mode<synchronous>, transform_indices = @transform_1, window_bounds = array<i64: 16, 64>}, {transform_indices = @transform_2, window_bounds = array<i64: 64, 64>}]} {
    %c0 = arith.constant 0 : index
    %c0_0 = arith.constant 0 : index
    %0 = vector.load %arg1[%c0, %c0_0] : memref<64x16xf32, #tpu.memory_space<vmem>>, vector<64x16xf32>
    %c0_1 = arith.constant 0 : index
    %c0_2 = arith.constant 0 : index
    %1 = vector.load %arg2[%c0_1, %c0_2] : memref<16x64xf32, #tpu.memory_space<vmem>>, vector<16x64xf32>
    %cst = arith.constant dense<0.000000e+00> : vector<64x64xf32>
    %2 = tpu.matmul %0, %1, %cst {dimension_numbers = #tpu.dot_dimension_numbers<[1], [0], [0], [1], [0, 0, 1, 1], [], []>} : vector<64x16xf32>, vector<16x64xf32>, vector<64x64xf32> -> vector<64x64xf32>
    %c0_3 = arith.constant 0 : index
    %c0_4 = arith.constant 0 : index
    %3 = vector.load %arg3[%c0_3, %c0_4] : memref<64x64xf32, #tpu.memory_space<vmem>>, vector<64x64xf32>
    tpu.vector_store %arg3[%c0_3, %c0_4], %2 {strides = array<i32>} : memref<64x64xf32, #tpu.memory_space<vmem>>, vector<64x64xf32>,
    return
  }
  func.func @transform_0(%arg0: i32) -> (i32, i32) {
    %c0_i32 = arith.constant 0 : i32
    %c0_i32_0 = arith.constant 0 : i32
    return %arg0, %c0_i32 : i32, i32
  }
  func.func @transform_1(%arg0: i32) -> (i32, i32) {
    %c0_i32 = arith.constant 0 : i32
    %c0_i32_0 = arith.constant 0 : i32
    %c0_i32_1 = arith.constant 0 : i32
    return %c0_i32, %c0_i32_0 : i32, i32
  }
  func.func @transform_2(%arg0: i32) -> (i32, i32) {
    %c0_i32 = arith.constant 0 : i32
    %c0_i32_0 = arith.constant 0 : i32
    return %arg0, %c0_i32 : i32, i32
  }
}

</mosaic_0001>

<bundles_post_ra>
// kernel: tpu_custom_call.1
= control target key start
LH: loop header
LB: loop body
LE: loop exit
PB: predicated region body
PF: predicated region fallthrough
CT: control target
= control target key end

     0   :  { %s432_s9 = smov 0   ;;  %s471_s0 = inlined_call_operand.vmem [shape: f32[128,16], index: 0, kind: input, shape index: {}]   ;;  %s472_s1 = inlined_call_operand.vmem [shape: f32[16,64], index: 1, kind: input, shape index: {}]   ;;  %s473_s2 = inlined_call_operand.vmem [shape: f32[128,64], index: 2, kind: output, shape index: {}]  }
   0x1 LB: > { %s352_s10 = sadd.s32 4294967295, %s415_s9   ;;  %p356_p0 = scmp.ge.s32.totalorder %s415_s9, 1  ;;  %s415_s9 = sphi %s432_s9, %s12_s9  }
   0x2   : > { %p113_p1 = scmp.lt.s32.totalorder %s415_s9, 3 }
   0x4   : > { %p114_p2 = pnand %p356_p0, %p113_p1 }
   0x5   : > { %s357_s15 = sshll.u32 (!%p114_p2), %s352_s10, 3 }
   0x6   : > { %117 = sbr.rel (%p114_p2) target bundleno = 217 (0xd9), region = 28  ;;  %p136_p3 = scmp.lt.s32.totalorder (!%p114_p2), %s357_s15, 15 }
   0xb   : > { %v156_v0 = vld [vmem:[%s472_s1 + $0x8] sm:$0xff]  ;;  %v155_v1 = vld [vmem:[%s472_s1] sm:$0xff]  ;;  %s475_s15 = smov (!%p136_p3, %s357_s15), 15  ;;  %vm157_vm0 = vcmask 130048   ;;  %vm287_vm1 = vcmask 523264  }
   0xc   : > { %381 = vmatprep.subr.mxu0 %v156_v0  ;;  %397 = vmatprep.subr.mxu1 %v156_v0  ;;  %s358_s16 = sshll.u32 %s475_s15, 3 }
   0xd   : > { %382 = vmatpush3.msra.mxu0 %v156_v0  ;;  %399 = vmatpush3.msra.mxu1 %v156_v0  ;;  %s139_s19 = scalar_lea.vmem %s471_s0, %s358_s16  ;;  %s145_s22 = scalar_lea.vmem %s473_s2, %s358_s16 }
   0xe   : > { %383 = vmatprep.subr.mxu0 %v155_v1  ;;  %398 = vmatprep.subr.mxu1 %v155_v1  ;;  %v147_v2 = vld [vmem:[%s139_s19] sm:$0xff]  ;;  %v148_v4 = vld [vmem:[%s139_s19 + $0x8] sm:$0xff]  ;;  %v149_v6 = vld [vmem:[%s139_s19 + $0x10] sm:$0xff] }
   0xf   : > { %384 = vmatpush3.msra.mxu0 %v155_v1  ;;  %400 = vmatpush3.msra.mxu1 %v155_v1  ;;  %v151_v3 = vld [vmem:[%s139_s19 + $0x20] sm:$0xff]  ;;  %v152_v5 = vld [vmem:[%s139_s19 + $0x28] sm:$0xff]  ;;  %v153_v7 = vld [vmem:[%s139_s19 + $0x30] sm:$0xff] }
  0x10   : > { %385 = vmatprep.mubr.msk.f32.mxu0 %vm157_vm0, %v147_v2  ;;  %391 = vmatprep.mubr.msk.f32.mxu1 %vm157_vm0, %v151_v3  ;;  %v150_v8 = vld [vmem:[%s139_s19 + $0x18] sm:$0xff] }
  0x11   : > { %386 = vmatmul.mubr.msk.f32.vlgmr.msra.gmra.mxu0 %vm157_vm0, %v148_v4  ;;  %392 = vmatmul.mubr.msk.f32.vlgmr.msra.gmra.mxu1 %vm157_vm0, %v152_v5  ;;  %v154_v9 = vld [vmem:[%s139_s19 + $0x38] sm:$0xff] }
  0x12   : > { %388 = vmatprep.mubr.msk.f32.mxu0 %vm157_vm0, %v149_v6  ;;  %394 = vmatprep.mubr.msk.f32.mxu1 %vm157_vm0, %v153_v7 }
  0x15   : > { %389 = vmatmul.mubr.msk.f32.gmra.mxu0 %vm157_vm0, %v150_v8  ;;  %395 = vmatmul.mubr.msk.f32.gmra.mxu1 %vm157_vm0, %v154_v9 }
  0xd1   : > { %v387_v10 = vpop.f32.mrf.mxu0  ;;  %v393_v11 = vpop.f32.mrf.mxu1 }
  0xd2   : > { %289 = vst.msk [vmem:[%s145_s22 + $0x8] sm:$0xff] %vm287_vm1, %v387_v10  ;;  %293 = vst.msk [vmem:[%s145_s22 + $0x28] sm:$0xff] %vm287_vm1, %v393_v11 }
  0xd3   : > { %v248_v12 = vpop.f32.mrf.mxu0  ;;  %v268_v13 = vpop.f32.mrf.mxu1 }
  0xd4   : > { %288 = vst.msk [vmem:[%s145_s22] sm:$0xff] %vm287_vm1, %v248_v12  ;;  %292 = vst.msk [vmem:[%s145_s22 + $0x20] sm:$0xff] %vm287_vm1, %v268_v13 }
  0xd5   : > { %v390_v14 = vpop.f32.mrf.mxu0  ;;  %v396_v15 = vpop.f32.mrf.mxu1 }
  0xd6   : > { %291 = vst.msk [vmem:[%s145_s22 + $0x18] sm:$0xff] %vm287_vm1, %v390_v14  ;;  %295 = vst.msk [vmem:[%s145_s22 + $0x38] sm:$0xff] %vm287_vm1, %v396_v15 }
  0xd7   : > { %v258_v16 = vpop.f32.mrf.mxu0  ;;  %v278_v17 = vpop.f32.mrf.mxu1 }
  0xd8   : > { %290 = vst.msk [vmem:[%s145_s22 + $0x10] sm:$0xff] %vm287_vm1, %v258_v16  ;;  %294 = vst.msk [vmem:[%s145_s22 + $0x30] sm:$0xff] %vm287_vm1, %v278_v17 }
  0xd9 PF: > { %s12_s9 = sadd.s32 1, %s415_s9  }
  0xda   : > { %p9_p4 = scmp.ge.s32.totalorder %s12_s9, 4  }
  0xdc   :  { %11 = sbr.rel (!%p9_p4) target bundleno = 1 (0x1), region = 58 }

</bundles_post_ra>
